<compile_context>
chip_gen: v5e
topology: v5e:2x2
jax: 0.10.0
libtpu: 0.0.40
codegen_flags: <defaults>
</compile_context>

<pallas_src>
import functools

import jax
import jax.numpy as jnp
from jax.experimental import pallas as pl
from jax.experimental.pallas import tpu as pltpu


def critic_kernel(x_ref, w1_ref, b1_ref, w2t_ref, b2_ref, w3_ref, b3_ref, o_ref):
    """Fused 3-layer MLP on one batch tile (all f32).

    x_ref:  (bb, F)            w1:  (F, H1p)    b1: (1, H1p)
    w2t:    (H2, H1p) (=w2.T padded)            b2: (H2, 1)
    w3:     (H2, 1)            b3:  (1, 1)
    o_ref:  (1, bb)  -- lane-dense row of per-sample critic values.
    """
    # Layer 1 (MXU, f32 accumulation) + bias + ReLU, batch-major (bb, H1p).
    h1 = jnp.dot(x_ref[...], w1_ref[...], preferred_element_type=jnp.float32)
    h1 = jnp.maximum(h1 + b1_ref[...], 0.0)
    # Switch to feature-major once, on the smallest full-width intermediate.
    h1t = h1.T                                                       # (H1p, bb)
    # Layer 2 (MXU): w2.T @ h1.T -> (H2, bb); no transpose of the larger h2.
    h2t = jnp.dot(w2t_ref[...], h1t, preferred_element_type=jnp.float32)
    h2t = jnp.maximum(h2t + b2_ref[...], 0.0)                        # (H2, bb)
    # Layer 3: single output unit as VPU multiply + sublane reduction; the
    # result is already in the lane-dense (1, bb) output orientation.
    out = jnp.sum(h2t * w3_ref[...], axis=0, keepdims=True) + b3_ref[...]
    o_ref[...] = out.astype(o_ref.dtype)


def _round_up(x, m):
    return (x + m - 1) // m * m


def _num_tensorcores():
    """TensorCores a single Pallas grid can shard over (v7x/v4 megacore = 2)."""
    try:
        kind = jax.devices()[0].device_kind.lower()
    except Exception:  # no device info -> conservative serial-grid policy
        return 1
    return 2 if ("v7" in kind or "v4" in kind) else 1


@functools.partial(jax.jit, static_argnames=("block_b",))
def critic_forward(state, params, block_b=8192):
    """state: (B, n_features) f32 -> (B, 1) f32.

    params = (w1 (F,20), b1 (1,20), w2 (20,40), b2 (1,40), w3 (40,1), b3 (1,1));
    weights are stored transposed vs. torch.nn.Linear so the math is x @ W + b.
    """
    w1, b1, w2, b2, w3, b3 = params
    B, F = state.shape
    H1 = w1.shape[1]
    H2 = w2.shape[1]

    # Kernel-side weight layouts (all tiny; these reshapes / transposes / pads
    # are negligible wrapper ops — unlike any transform of `state`).
    w1 = w1.astype(jnp.float32)
    b1 = b1.astype(jnp.float32).reshape(1, H1)
    w2t = w2.astype(jnp.float32).T                  # (H2, H1)
    b2c = b2.astype(jnp.float32).reshape(H2, 1)     # column for (H2, bb) bcast
    w3c = w3.astype(jnp.float32).reshape(H2, 1)
    b3c = b3.astype(jnp.float32).reshape(1, 1)

    # Zero-pad hidden-1 width to a sublane multiple (20 -> 24) so the in-kernel
    # h1 transpose / transposed layer-2 operand are sublane-aligned.  Padded
    # columns of w2t are zero, so results are bit-identical.
    H1p = _round_up(H1, 8)
    if H1p != H1:
        w1 = jnp.pad(w1, ((0, 0), (0, H1p - H1)))
        b1 = jnp.pad(b1, ((0, 0), (0, H1p - H1)))
        w2t = jnp.pad(w2t, ((0, 0), (0, H1p - H1)))

    # Batch-tile / grid policy (generation aware):
    #  * B <= 256, or a 1-TensorCore part with B <= block_b: one full-extent
    #    block (any B is legal when block == array dim; on 1-TC parts the grid
    #    is a serial loop, so splitting only adds fixed per-step overhead).
    #  * otherwise: tiles that are a multiple of 128 (sublane rule for the
    #    state tile, lane rule for the lane-dense output tile), capped at
    #    block_b, sized so multi-TC parts get >= num_tensorcores steps.
    ntc = _num_tensorcores()
    if B <= 256 or (ntc == 1 and B <= block_b):
        bb = B
    else:
        n_steps = max(ntc, pl.cdiv(B, block_b))
        bb = min(block_b, _round_up(pl.cdiv(B, n_steps), 128))
    if bb != B:
        assert bb > 0 and bb % 128 == 0, (
            "batch tile must be a positive multiple of 128 when tiling")
    grid = (pl.cdiv(B, bb),)

    def full(shape):
        # Whole-array block, same block index every step -> stays resident.
        return pl.BlockSpec(shape, lambda i: (0,) * len(shape))

    out_lane = pl.pallas_call(
        critic_kernel,
        out_shape=jax.ShapeDtypeStruct((1, B), jnp.float32),     # lane-dense
        grid_spec=pltpu.PrefetchScalarGridSpec(
            num_scalar_prefetch=0,
            grid=grid,
            in_specs=[
                pl.BlockSpec((bb, F), lambda i: (i, 0)),  # state tile (f32)
                full((F, H1p)),    # w1  (padded)
                full((1, H1p)),    # b1  (padded)
                full((H2, H1p)),   # w2.T (padded)
                full((H2, 1)),     # b2 column
                full((H2, 1)),     # w3 column
                full((1, 1)),      # b3
            ],
            out_specs=pl.BlockSpec((1, bb), lambda i: (0, i)),
        ),
        compiler_params=pltpu.CompilerParams(
            dimension_semantics=("parallel",),
            vmem_limit_bytes=32 * 1024 * 1024,
        ),
    )(state.astype(jnp.float32), w1, b1, w2t, b2c, w3c, b3c)

    return out_lane.reshape(B, 1)


def init_critic_params(key, n_features):
    """Deterministic init mirroring torch.nn.Linear default U(-1/sqrt(fan_in), +)."""
    dims = [(n_features, 20), (20, 40), (40, 1)]
    params = []
    for (fan_in, fan_out) in dims:
        key, kw, kb = jax.random.split(key, 3)
        bound = 1.0 / jnp.sqrt(fan_in)
        w = jax.random.uniform(kw, (fan_in, fan_out), jnp.float32, -bound, bound)
        b = jax.random.uniform(kb, (1, fan_out), jnp.float32, -bound, bound)
        params += [w, b]
    return tuple(params)


def critic_reference(state, params):
    """Pure-f32 reference (matches the PyTorch module semantics)."""
    w1, b1, w2, b2, w3, b3 = params
    h1 = jnp.maximum(state @ w1 + b1, 0.0)
    h2 = jnp.maximum(h1 @ w2 + b2, 0.0)
    return h2 @ w3 + b3


if __name__ == "__main__":
    n_features = 32
    n_actions = 4   # unused in forward (torch.concat([state]) is a no-op)
    batch = 16

    key = jax.random.PRNGKey(0)
    key, kx = jax.random.split(key)
    state = jax.random.normal(kx, (batch, n_features), dtype=jnp.float32)
    params = init_critic_params(key, n_features)

    # Small batch: single full-extent tile.
    out = jax.block_until_ready(critic_forward(state, params))
    ref = critic_reference(state, params)
    assert out.shape == (batch, 1), out.shape
    assert jnp.allclose(out, ref, atol=2e-4, rtol=2e-4), "mismatch vs f32 reference"

    # Larger batch: exercises the generation-aware tiling policy (single big
    # tile on 1-TC parts, >=2-way split on multi-TC parts).
    big_b = 2000
    key, kb = jax.random.split(key)
    state_big = jax.random.normal(kb, (big_b, n_features), dtype=jnp.float32)
    out_big = jax.block_until_ready(critic_forward(state_big, params))
    ref_big = critic_reference(state_big, params)
    assert out_big.shape == (big_b, 1), out_big.shape
    assert jnp.allclose(out_big, ref_big, atol=2e-4, rtol=2e-4), "large-batch mismatch"

    # Force the multi-step grid + partial final tile path on any generation.
    out_split = jax.block_until_ready(critic_forward(state_big, params, block_b=1024))
    assert jnp.allclose(out_split, ref_big, atol=2e-4, rtol=2e-4), "tiled path mismatch"

    print("KERNEL_OK")
</pallas_src>

<mosaic_0001>
module attributes {stable_mosaic.version = 11 : i64} {
  func.func @critic_kernel(%arg0: i32, %arg1: memref<16x32xf32, #tpu.memory_space<vmem>>, %arg2: memref<32x24xf32, #tpu.memory_space<vmem>>, %arg3: memref<1x24xf32, #tpu.memory_space<vmem>>, %arg4: memref<40x24xf32, #tpu.memory_space<vmem>>, %arg5: memref<40x1xf32, #tpu.memory_space<vmem>>, %arg6: memref<40x1xf32, #tpu.memory_space<vmem>>, %arg7: memref<1x1xf32, #tpu.memory_space<vmem>>, %arg8: memref<1x16xf32, #tpu.memory_space<vmem>>) attributes {dimension_semantics = [#tpu.dimension_semantics<parallel>], iteration_bounds = array<i64: 1>, scalar_prefetch = 0 : i64, scratch_operands = 0 : i64, tpu.core_type = #tpu.core_type<tc>, window_params = [{transform_indices = @transform_0, window_bounds = array<i64: 16, 32>}, {pipeline_mode = #tpu.pipeline_mode<synchronous>, transform_indices = @transform_1, window_bounds = array<i64: 32, 24>}, {pipeline_mode = #tpu.pipeline_mode<synchronous>, transform_indices = @transform_2, window_bounds = array<i64: 1, 24>}, {pipeline_mode = #tpu.pipeline_mode<synchronous>, transform_indices = @transform_3, window_bounds = array<i64: 40, 24>}, {pipeline_mode = #tpu.pipeline_mode<synchronous>, transform_indices = @transform_4, window_bounds = array<i64: 40, 1>}, {pipeline_mode = #tpu.pipeline_mode<synchronous>, transform_indices = @transform_5, window_bounds = array<i64: 40, 1>}, {pipeline_mode = #tpu.pipeline_mode<synchronous>, transform_indices = @transform_6, window_bounds = array<i64: 1, 1>}, {transform_indices = @transform_7, window_bounds = array<i64: 1, 16>}]} {
    %c0 = arith.constant 0 : index
    %c0_0 = arith.constant 0 : index
    %0 = vector.load %arg1[%c0, %c0_0] : memref<16x32xf32, #tpu.memory_space<vmem>>, vector<16x32xf32>
    %c0_1 = arith.constant 0 : index
    %c0_2 = arith.constant 0 : index
    %1 = vector.load %arg2[%c0_1, %c0_2] : memref<32x24xf32, #tpu.memory_space<vmem>>, vector<32x24xf32>
    %cst = arith.constant dense<0.000000e+00> : vector<16x24xf32>
    %2 = tpu.matmul %0, %1, %cst {dimension_numbers = #tpu.dot_dimension_numbers<[1], [0], [0], [1], [0, 0, 1, 1], [], []>} : vector<16x32xf32>, vector<32x24xf32>, vector<16x24xf32> -> vector<16x24xf32>
    %c0_3 = arith.constant 0 : index
    %c0_4 = arith.constant 0 : index
    %3 = vector.load %arg3[%c0_3, %c0_4] : memref<1x24xf32, #tpu.memory_space<vmem>>, vector<1x24xf32>
    %4 = vector.broadcast %3 : vector<1x24xf32> to vector<16x24xf32>
    %5 = arith.addf %2, %4 : vector<16x24xf32>
    %cst_5 = arith.constant 0.000000e+00 : f32
    %6 = vector.broadcast %cst_5 : f32 to vector<16x24xf32>
    %7 = arith.maximumf %5, %6 : vector<16x24xf32>
    %8 = tpu.transpose %7, [1, 0] : vector<16x24xf32> -> vector<24x16xf32>
    %c0_6 = arith.constant 0 : index
    %c0_7 = arith.constant 0 : index
    %9 = vector.load %arg4[%c0_6, %c0_7] : memref<40x24xf32, #tpu.memory_space<vmem>>, vector<40x24xf32>
    %cst_8 = arith.constant dense<0.000000e+00> : vector<40x16xf32>
    %10 = tpu.matmul %9, %8, %cst_8 {dimension_numbers = #tpu.dot_dimension_numbers<[1], [0], [0], [1], [0, 0, 1, 1], [], []>} : vector<40x24xf32>, vector<24x16xf32>, vector<40x16xf32> -> vector<40x16xf32>
    %c0_9 = arith.constant 0 : index
    %c0_10 = arith.constant 0 : index
    %11 = vector.load %arg5[%c0_9, %c0_10] : memref<40x1xf32, #tpu.memory_space<vmem>>, vector<40x1xf32>
    %12 = vector.broadcast %11 : vector<40x1xf32> to vector<40x16xf32>
    %13 = arith.addf %10, %12 : vector<40x16xf32>
    %cst_11 = arith.constant 0.000000e+00 : f32
    %14 = vector.broadcast %cst_11 : f32 to vector<40x16xf32>
    %15 = arith.maximumf %13, %14 : vector<40x16xf32>
    %c0_12 = arith.constant 0 : index
    %c0_13 = arith.constant 0 : index
    %16 = vector.load %arg6[%c0_12, %c0_13] : memref<40x1xf32, #tpu.memory_space<vmem>>, vector<40x1xf32>
    %17 = vector.broadcast %16 : vector<40x1xf32> to vector<40x16xf32>
    %18 = arith.mulf %15, %17 : vector<40x16xf32>
    %cst_14 = arith.constant dense<0.000000e+00> : vector<16xf32>
    %19 = vector.multi_reduction <add>, %18, %cst_14 [0] : vector<40x16xf32> to vector<16xf32>
    %20 = vector.shape_cast %19 : vector<16xf32> to vector<1x16xf32>
    %c0_15 = arith.constant 0 : index
    %c0_16 = arith.constant 0 : index
    %21 = vector.load %arg7[%c0_15, %c0_16] : memref<1x1xf32, #tpu.memory_space<vmem>>, vector<1x1xf32>
    %22 = vector.broadcast %21 : vector<1x1xf32> to vector<1x16xf32>
    %23 = arith.addf %20, %22 : vector<1x16xf32>
    %c0_17 = arith.constant 0 : index
    %c0_18 = arith.constant 0 : index
    %24 = vector.load %arg8[%c0_17, %c0_18] : memref<1x16xf32, #tpu.memory_space<vmem>>, vector<1x16xf32>
    tpu.vector_store %arg8[%c0_17, %c0_18], %23 {strides = array<i32>} : memref<1x16xf32, #tpu.memory_space<vmem>>, vector<1x16xf32>,
    return
  }
  func.func @transform_0(%arg0: i32) -> (i32, i32) {
    %c0_i32 = arith.constant 0 : i32
    %c0_i32_0 = arith.constant 0 : i32
    return %arg0, %c0_i32 : i32, i32
  }
  func.func @transform_1(%arg0: i32) -> (i32, i32) {
    %c0_i32 = arith.constant 0 : i32
    %c0_i32_0 = arith.constant 0 : i32
    %c0_i32_1 = arith.constant 0 : i32
    return %c0_i32, %c0_i32_0 : i32, i32
  }
  func.func @transform_2(%arg0: i32) -> (i32, i32) {
    %c0_i32 = arith.constant 0 : i32
    %c0_i32_0 = arith.constant 0 : i32
    %c0_i32_1 = arith.constant 0 : i32
    return %c0_i32, %c0_i32_0 : i32, i32
  }
  func.func @transform_3(%arg0: i32) -> (i32, i32) {
    %c0_i32 = arith.constant 0 : i32
    %c0_i32_0 = arith.constant 0 : i32
    %c0_i32_1 = arith.constant 0 : i32
    return %c0_i32, %c0_i32_0 : i32, i32
  }
  func.func @transform_4(%arg0: i32) -> (i32, i32) {
    %c0_i32 = arith.constant 0 : i32
    %c0_i32_0 = arith.constant 0 : i32
    %c0_i32_1 = arith.constant 0 : i32
    return %c0_i32, %c0_i32_0 : i32, i32
  }
  func.func @transform_5(%arg0: i32) -> (i32, i32) {
    %c0_i32 = arith.constant 0 : i32
    %c0_i32_0 = arith.constant 0 : i32
    %c0_i32_1 = arith.constant 0 : i32
    return %c0_i32, %c0_i32_0 : i32, i32
  }
  func.func @transform_6(%arg0: i32) -> (i32, i32) {
    %c0_i32 = arith.constant 0 : i32
    %c0_i32_0 = arith.constant 0 : i32
    %c0_i32_1 = arith.constant 0 : i32
    return %c0_i32, %c0_i32_0 : i32, i32
  }
  func.func @transform_7(%arg0: i32) -> (i32, i32) {
    %c0_i32 = arith.constant 0 : i32
    %c0_i32_0 = arith.constant 0 : i32
    return %c0_i32, %arg0 : i32, i32
  }
}

</mosaic_0001>

<bundles_post_ra>
// kernel: critic_forward.1
= control target key start
LH: loop header
LB: loop body
LE: loop exit
PB: predicated region body
PF: predicated region fallthrough
CT: control target
= control target key end

     0   :  { %s417_s0 = inlined_call_operand.vmem [shape: f32[16,32], index: 0, kind: input, shape index: {}]   ;;  %s418_s1 = inlined_call_operand.vmem [shape: f32[32,24], index: 1, kind: input, shape index: {}]   ;;  %s419_s2 = inlined_call_operand.vmem [shape: f32[1,24], index: 2, kind: input, shape index: {}]   ;;  %s420_s3 = inlined_call_operand.vmem [shape: f32[40,24], index: 3, kind: input, shape index: {}]   ;;  %s421_s4 = inlined_call_operand.vmem [shape: f32[40,1], index: 4, kind: input, shape index: {}]   ;;  %s422_s5 = inlined_call_operand.vmem [shape: f32[40,1], index: 5, kind: input, shape index: {}]   ;;  %s423_s6 = inlined_call_operand.<no memory space> [shape: f32[1,1], index: 6, kind: input, shape index: {}]   ;;  %s424_s7 = inlined_call_operand.hbm [shape: f32[1,16], index: 7, kind: output, shape index: {}]  }
   0x1   :  { %v12_v0 = vstv %s423_s6 }
   0x2   :  { %13 = vst [vmem:[#allocation2] sm:$0x1] %v12_v0 }
   0x3   :  { %v34_v1 = vld [vmem:[%s418_s1 + $0x18] sm:$0xff]  ;;  %v33_v2 = vld [vmem:[%s418_s1 + $0x10] sm:$0xff]  ;;  %v287_v3 = vmov 0   ;;  %v32_v4 = vld [vmem:[%s418_s1 + $0x8] sm:$0xff] }
   0x4   :  { %58 = vmatpush.msra.mxu0 %v34_v1  ;;  %257 = vset.pattern.permute.xlu0 %v287_v3 }
   0x5   :  { %258 = vset.pattern.permute.xlu1 %v287_v3  ;;  %259 = vset.pattern.permute.xlu2 %v287_v3 }
   0x6   :  { %14 = vsyncpa [#allocation4], 0  ;;  %59 = vmatpush.msra.mxu0 %v33_v2  ;;  %v31_v5 = vld [vmem:[%s418_s1] sm:$0xff]  ;;  %vm39_vm0 = vcmask 261120   ;;  %v30_v7 = vld [vmem:[%s417_s0 + $0x8] sm:$0xff]  ;;  %vm106_vm1 = vcmask 195584  }
   0x7   :  { %v29_v6 = vld [vmem:[%s417_s0] sm:$0xff]  ;;  %v78_v9 = vld [vmem:[%s421_s4 + $0x10] sm:$0xff]  ;;  %v77_v10 = vld [vmem:[%s421_s4 + $0x8] sm:$0xff]  ;;  %vm200_vm2 = vcmask 130048   ;;  %s233_s19 = sshll.u32 %s424_s7, 4  ;;  %vm224_vm3 = vcmask 122880   ;;  %s234_s19 = int_to_ptr.hbm [resolvable:$true] %s233_s19 }
   0x8   :  { %60 = vmatpush.msra.mxu0 %v32_v4  ;;  %v76_v8 = vld [vmem:[%s421_s4] sm:$0xff]  ;;  %93 = vperm.xlu1 %258, %v78_v9   ;;  %v79_v11 = vld [vmem:[%s421_s4 + $0x18] sm:$0xff]  ;;  %v167_v13 = vld [vmem:[%s422_s5 + $0x10] sm:$0xff] }
   0x9   :  { %83 = vperm.xlu0 %257, %v76_v8   ;;  %v80_v12 = vld [vmem:[%s421_s4 + $0x20] sm:$0xff]  ;;  %v166_v18 = vld [vmem:[%s422_s5 + $0x8] sm:$0xff]  ;;  %v168_v24 = vld [vmem:[%s422_s5 + $0x18] sm:$0xff] }
   0xa   :  { %61 = vmatpush.msra.mxu0 %v31_v5  ;;  %v169_v14 = vld [vmem:[%s422_s5 + $0x20] sm:$0xff]  ;;  %v73_v27 = vld [vmem:[%s420_s3 + $0x10] sm:$0xff]  ;;  %v74_v28 = vld [vmem:[%s420_s3 + $0x18] sm:$0xff] }
   0xb   :  { %242 = vmatmul.msk.f32.vlgmr.msra.gmra.mxu0 %vm39_vm0, %v29_v6  ;;  %v216_v15 = vld [vmem:[#allocation2] sm:$0x1]  ;;  %v72_v29 = vld [vmem:[%s420_s3 + $0x8] sm:$0xff] }
   0xc   :  { %v165_v16 = vld [vmem:[%s422_s5] sm:$0xff] }
   0xd   :  { %172 = vperm.xlu2 %259, %v165_v16   ;;  %v260_v19 = vld [vmem:[%s419_s2] ss:$0 sm:$0xff] }
   0xe   :  { %v71_v26 = vld [vmem:[%s420_s3] sm:$0xff] }
   0xf   :  { %v75_v30 = vld [vmem:[%s420_s3 + $0x20] sm:$0xff]  ;;  %s288_s3 = smov [#allocation3]  }
  0x10   :  { %98 = vperm.xlu1 %258, %v79_v11   ;;  %s231_s1 = sshll.u32 %s288_s3, 4  ;;  %s232_s1 = int_to_ptr.vmem [resolvable:$true] %s231_s1 }
  0x11   :  { %88 = vperm.xlu0 %257, %v77_v10  }
  0x13   :  { %243 = vmatmul.msk.f32.gmra.mxu0 %vm39_vm0, %v30_v7 }
  0x15   :  { %177 = vperm.xlu2 %259, %v166_v18  }
  0x18   :  { %182 = vperm.xlu1 %258, %v167_v13  }
  0x19   :  { %103 = vperm.xlu0 %257, %v80_v12  }
  0x1d   :  { %187 = vperm.xlu2 %259, %v168_v24  }
  0x20   :  { %219 = vperm.xlu1 %258, %v216_v15  }
  0x21   :  { %192 = vperm.xlu0 %257, %v169_v14  }
  0x67   :  { %v173_v33 = vpop.permute.xlu2 %172 }
  0x6f   :  { %v178_v38 = vpop.permute.xlu2 %177 }
  0x77   :  { %v188_v54 = vpop.permute.xlu2 %187 }
  0x7a   :  { %v94_v32 = vpop.permute.xlu1 %93 }
  0x7b   :  { %v84_v31 = vpop.permute.xlu0 %83 }
  0x82   :  { %v99_v36 = vpop.permute.xlu1 %98 }
  0x83   :  { %v89_v34 = vpop.permute.xlu0 %88 }
  0x88   :  { %v63_v17 = vpop.f32.mrf.mxu0 }
  0x89   :  { %v64_v22 = vadd.f32 %v260_v19, %v63_v17 }
  0x8a   :  { %v183_v51 = vpop.permute.xlu1 %182 }
  0x8b   :  { %v69_v25 = vmax.f32 %v64_v22, 0.0  ;;  %v104_v45 = vpop.permute.xlu0 %103 }
  0x90   :  { %v66_v20 = vpop.f32.mrf.mxu0 }
  0x91   :  { %v67_v21 = vadd.f32 %v260_v19, %v66_v20 }
  0x92   :  { %v220_v10 = vpop.permute.xlu1 %219 }
  0x93   :  { %v70_v23 = vmax.f32 %v67_v21, 0.0  ;;  %v193_v0 = vpop.permute.xlu0 %192  ;;  %v222_v12 = vperm.slane %v220_v10, 0 }
  0x95   :  { %244 = vmatpush.xpose.msk.msra.mxu1 %vm106_vm1, %v70_v23  ;;  %251 = vmatpush.xpose.msk.msra.mxu2 %vm106_vm1, %v70_v23 }
  0x96   :  { %252 = vmatpush.xpose.msk.msra.mxu3 %vm106_vm1, %v70_v23 }
  0x99   :  { %245 = vmatpush.xpose.msk.msra.mxu1 %vm106_vm1, %v69_v25  ;;  %253 = vmatpush.xpose.msk.msra.mxu2 %vm106_vm1, %v69_v25 }
  0x9a   :  { %254 = vmatpush.xpose.msk.msra.mxu3 %vm106_vm1, %v69_v25 }
  0x9c   :  { %246 = vmatmul.msk.f32.vlgmr.msra.gmra.mxu1 %vm106_vm1, %v71_v26  ;;  %248 = vmatmul.msk.f32.vlgmr.msra.gmra.mxu2 %vm106_vm1, %v73_v27 }
  0x9d   :  { %249 = vmatmul.msk.f32.vlgmr.msra.gmra.mxu3 %vm106_vm1, %v74_v28 }
  0xa4   :  { %247 = vmatmul.msk.f32.gmra.mxu1 %vm106_vm1, %v72_v29 }
  0xa5   :  { %250 = vmatmul.msk.f32.gmra.mxu3 %vm106_vm1, %v75_v30 }
 0x119   :  { %v145_v35 = vpop.f32.mrf.mxu1 }
 0x11a   :  { %v146_v37 = vadd.f32 %v145_v35, %v84_v31 }
 0x11c   :  { %v160_v40 = vmax.f32 %v146_v37, 0.0 }
 0x11e   :  { %v195_v48 = vmul.f32 %v173_v33, %v160_v40 }
 0x11f   :  { %v151_v39 = vpop.f32.mrf.mxu2 }
 0x120   :  { %v152_v41 = vadd.f32 %v151_v39, %v94_v32  ;;  %v154_v42 = vpop.f32.mrf.mxu3  ;;  %v201_v55 = vsel %vm200_vm2, %v195_v48, 0.0 }
 0x121   :  { %v155_v43 = vadd.f32 %v154_v42, %v99_v36  ;;  %v148_v44 = vpop.f32.mrf.mxu1 }
 0x122   :  { %v162_v46 = vmax.f32 %v152_v41, 0.0  ;;  %v149_v47 = vadd.f32 %v148_v44, %v89_v34 }
 0x123   :  { %v163_v49 = vmax.f32 %v155_v43, 0.0 }
 0x124   :  { %v161_v50 = vmax.f32 %v149_v47, 0.0  ;;  %v197_v52 = vmul.f32 %v183_v51, %v162_v46 }
 0x125   :  { %v198_v56 = vmul.f32 %v188_v54, %v163_v49 }
 0x126   :  { %v196_v53 = vmul.f32 %v178_v38, %v161_v50  ;;  %v204_v61 = vsel %vm200_vm2, %v197_v52, 0.0 }
 0x127   :  { %v206_v1 = vsel %vm200_vm2, %v198_v56, 0.0 }
 0x128   :  { %v202_v57 = vsel %vm200_vm2, %v196_v53, 0.0  ;;  %v157_v58 = vpop.f32.mrf.mxu3 }
 0x129   :  { %v203_v59 = vadd.f32 %v202_v57, %v201_v55  ;;  %v158_v60 = vadd.f32 %v157_v58, %v104_v45 }
 0x12b   :  { %v205_v62 = vadd.f32 %v204_v61, %v203_v59  ;;  %v164_v63 = vmax.f32 %v158_v60, 0.0 }
 0x12d   :  { %v199_v2 = vmul.f32 %v193_v0, %v164_v63  ;;  %v207_v3 = vadd.f32 %v206_v1, %v205_v62 }
 0x12f   :  { %v208_v4 = vsel %vm200_vm2, %v199_v2, 0.0 }
 0x130   :  { %v209_v5 = vadd.f32 %v208_v4, %v207_v3 }
 0x132   :  { %v210_v6 = vrot.slane %v209_v5, 4 }
 0x134   :  { %v211_v7 = vadd.f32 %v210_v6, %v209_v5 }
 0x136   :  { %v212_v8 = vrot.slane %v211_v7, 2 }
 0x138   :  { %v213_v9 = vadd.f32 %v212_v8, %v211_v7 }
 0x13a   :  { %v214_v11 = vrot.slane %v213_v9, 1 }
 0x13c   :  { %v215_v13 = vadd.f32 %v214_v11, %v213_v9 }
 0x13e   :  { %v223_v14 = vadd.f32 %v222_v12, %v215_v13 }
 0x140   :  { %225 = vst.msk [vmem:[#allocation3] sm:$0x1] %vm224_vm3, %v223_v14 }
 0x141   :  { %236 = dma.vmem_to_hbm [thread:$0]  %s232_s1, 16, %s234_s19, [#allocation4]  }
 0x142   :  { %285 = dma.done.wait [#allocation4], 16  }
 0x143   :  { %286 = vsyncadd [#allocation4], 4294967280 }
 0x144   :  { %241 = vsyncpa [#allocation4], 1 }

</bundles_post_ra>
